<compile_context>
chip_gen: v5e
topology: v5e:2x2
jax: 0.10.0
libtpu: 0.0.40
codegen_flags: <defaults>
</compile_context>

<pallas_src>
import numpy as np
import jax
import jax.numpy as jnp
from jax.experimental import pallas as pl
from jax.experimental.pallas import tpu as pltpu


def _round_up(x, m):
    return (x + m - 1) // m * m


def _critic_kernel(s_ref, a_ref, w1s_ref, w1a_ref, b1_ref, w2_ref, b2_ref,
                   w3_ref, b3_ref, out_ref):
    """One batch tile of the fused 3-layer MLP. All operands live in VMEM."""
    cdt = w1s_ref.dtype
    # In-kernel cast of the f32 input tiles to the compute dtype (free on the VPU
    # under MXU slack; avoids a separate wrapper-side cast pass over HBM).
    s = s_ref[...].astype(cdt)
    a = a_ref[...].astype(cdt)

    # fc1 on the (implicitly) concatenated input, expressed as a split matmul.
    h1 = (jnp.dot(s, w1s_ref[...], preferred_element_type=jnp.float32)
          + jnp.dot(a, w1a_ref[...], preferred_element_type=jnp.float32)
          + b1_ref[...])
    h1 = jnp.maximum(h1, 0.0).astype(w2_ref.dtype)                 # (TB, fc1p)

    h2 = jnp.dot(h1, w2_ref[...], preferred_element_type=jnp.float32) + b2_ref[...]
    h2 = jnp.maximum(h2, 0.0).astype(w3_ref.dtype)                 # (TB, fc2p)

    # fc3: straight MXU matmul against the padded weight column -> (TB, 1).
    # (No dot_general with a contraction on dim-1 of both operands -> no hidden
    #  XLU transpose of h2 stealing vector-extended slots from vmatmul.)
    q = jnp.dot(h2, w3_ref[...], preferred_element_type=jnp.float32)   # (TB, 1)
    out_ref[...] = (q + b3_ref[...]).astype(out_ref.dtype)


def low_dim_critic_forward(states, actions, kparams, *, tb_max=4096,
                           vmem_limit_bytes=None):
    """Run the fused critic forward. kparams must come from prepare_params().
    states/actions are passed in f32; the bf16 (or f32) cast happens in-kernel."""
    w1s, w1a, b1, w2, b2, w3, b3 = (
        kparams[k] for k in ("w1s", "w1a", "b1", "w2", "b2", "w3", "b3"))
    batch, state_dim = states.shape
    action_dim = actions.shape[1]
    assert w1s.shape[0] == state_dim and w1a.shape[0] == action_dim
    fc1_p = w1s.shape[1]
    fc2_p = w2.shape[1]

    # Batch tile:
    #   * multiple of 8 sublanes (inputs stay f32; intermediates are in-register),
    #   * target >=2 tiles so ("parallel",) can shard across v7x's 2 TensorCores,
    #   * multiples of 256 MXU rows, capped at tb_max and a v7x-safe 8192
    #     (working set ~ tb * 1.7 KB << 32 MiB scoped VMEM on all generations).
    sub = 8
    tb_cap = _round_up(min(tb_max, 8192), 256)
    tb = min(tb_cap, _round_up((batch + 1) // 2, 256))
    tb = max(sub, min(tb, _round_up(batch, sub)))
    num_tiles = pl.cdiv(batch, tb)
    b_pad = num_tiles * tb

    # Advisory cost estimate so XLA schedules neighboring ops sensibly.
    in_dim = state_dim + action_dim
    weight_bytes = sum(int(a.size) * a.dtype.itemsize
                       for a in (w1s, w1a, b1, w2, b2, w3, b3))
    cost = pl.CostEstimate(
        flops=2 * b_pad * (in_dim * fc1_p + fc1_p * fc2_p + fc2_p),
        transcendentals=0,
        bytes_accessed=batch * in_dim * 4 + batch * 4 + weight_bytes)

    fixed = lambda i: (0, 0)   # weights/biases: resident across all batch tiles
    grid_spec = pltpu.PrefetchScalarGridSpec(
        num_scalar_prefetch=0,
        grid=(num_tiles,),
        in_specs=[
            pl.BlockSpec((tb, state_dim), lambda i: (i, 0)),
            pl.BlockSpec((tb, action_dim), lambda i: (i, 0)),
            pl.BlockSpec(w1s.shape, fixed),
            pl.BlockSpec(w1a.shape, fixed),
            pl.BlockSpec(b1.shape, fixed),
            pl.BlockSpec(w2.shape, fixed),
            pl.BlockSpec(b2.shape, fixed),
            pl.BlockSpec(w3.shape, fixed),
            pl.BlockSpec(b3.shape, fixed),
        ],
        out_specs=pl.BlockSpec((tb, 1), lambda i: (i, 0)),
    )

    out = pl.pallas_call(
        _critic_kernel,
        out_shape=jax.ShapeDtypeStruct((b_pad, 1), jnp.float32),
        grid_spec=grid_spec,
        compiler_params=pltpu.CompilerParams(
            dimension_semantics=("parallel",),      # shards batch tiles on v7x's 2 TCs
            vmem_limit_bytes=vmem_limit_bytes),
        cost_estimate=cost,
    )(states, actions, w1s, w1a, b1, w2, b2, w3, b3)

    # Tail-tile rows beyond `batch` are computed from undefined padding and sliced off.
    return out[:batch]


def prepare_params(raw, state_dim, compute_dtype=jnp.bfloat16):
    """One-time (outside the hot path) param prep: split w1 into state/action halves,
    zero-pad hidden dims to multiples of 128 lanes, and cast weights to the compute
    dtype (biases stay f32; accumulation in the kernel is always f32).
    Padding is exact: padded fc1/fc2 channels are relu(0)=0 and padded w2/w3 rows are
    0, so they contribute nothing."""
    w1, b1, w2, b2, w3, b3 = (raw[k] for k in ("w1", "b1", "w2", "b2", "w3", "b3"))
    input_size, fc1 = w1.shape
    fc2 = w2.shape[1]
    fc1_p = _round_up(fc1, 128)
    fc2_p = _round_up(fc2, 128)

    w1_pad = jnp.pad(w1, ((0, 0), (0, fc1_p - fc1)))
    w2_pad = jnp.pad(w2, ((0, fc1_p - fc1), (0, fc2_p - fc2)))
    w3_pad = jnp.pad(w3, ((0, fc2_p - fc2), (0, 0)))               # (fc2_p, 1) column

    return {
        "w1s": w1_pad[:state_dim].astype(compute_dtype),
        "w1a": w1_pad[state_dim:].astype(compute_dtype),
        "b1": jnp.pad(b1, ((0, 0), (0, fc1_p - fc1))).astype(jnp.float32),
        "w2": w2_pad.astype(compute_dtype),
        "b2": jnp.pad(b2, ((0, 0), (0, fc2_p - fc2))).astype(jnp.float32),
        "w3": w3_pad.astype(compute_dtype),
        "b3": b3.astype(jnp.float32),
    }


def init_params(key, input_size, fc1_units, fc2_units):
    """Deterministic init mirroring the module's reset_parameters().
    hidden_init() in the reference uses weight.size()[0] == out_features for the
    limit (init-only quirk); biases keep nn.Linear's default uniform(+-1/sqrt(in)).
    Weights are stored (in, out) so the kernel computes y = x @ W + b."""
    ks = jax.random.split(key, 6)

    def unif(k, shape, lim):
        return jax.random.uniform(k, shape, jnp.float32, minval=-lim, maxval=lim)

    lim1 = 1.0 / np.sqrt(fc1_units)
    lim2 = 1.0 / np.sqrt(fc2_units)
    return {
        "w1": unif(ks[0], (input_size, fc1_units), lim1),
        "b1": unif(ks[1], (1, fc1_units), 1.0 / np.sqrt(input_size)),
        "w2": unif(ks[2], (fc1_units, fc2_units), lim2),
        "b2": unif(ks[3], (1, fc2_units), 1.0 / np.sqrt(fc1_units)),
        "w3": unif(ks[4], (fc2_units, 1), 0.003),
        "b3": unif(ks[5], (1, 1), 1.0 / np.sqrt(fc2_units)),
    }


def _jax_reference(states, actions, raw):
    xs = jnp.concatenate([states, actions], axis=1)
    h1 = jnp.maximum(xs @ raw["w1"] + raw["b1"], 0.0)
    h2 = jnp.maximum(h1 @ raw["w2"] + raw["b2"], 0.0)
    return h2 @ raw["w3"] + raw["b3"]


if __name__ == "__main__":
    key = jax.random.PRNGKey(0)
    state_dim, action_dim = 24, 8
    input_size = state_dim + action_dim

    # --- Config A: small hidden sizes (exercises the fc2=64 lane-padding path) ---
    batch = 2
    fc1_units, fc2_units = 128, 64
    k_s, k_a, k_p = jax.random.split(key, 3)
    states = jax.random.normal(k_s, (batch, state_dim), jnp.float32)
    actions = jax.random.normal(k_a, (batch, action_dim), jnp.float32)
    raw = init_params(k_p, input_size, fc1_units, fc2_units)
    q_ref = _jax_reference(states, actions, raw)

    # f32 kernel path: tight tolerance (checks split-w1 / padding / (tb,1) store).
    p_f32 = prepare_params(raw, state_dim, compute_dtype=jnp.float32)
    q_f32 = jax.block_until_ready(low_dim_critic_forward(states, actions, p_f32))
    np.testing.assert_allclose(np.asarray(q_f32), np.asarray(q_ref), rtol=1e-5, atol=1e-5)

    # bf16-matmul / f32-accumulate path (recommended fast path): loose tolerance.
    p_bf16 = prepare_params(raw, state_dim, compute_dtype=jnp.bfloat16)
    q_bf16 = jax.block_until_ready(low_dim_critic_forward(states, actions, p_bf16))
    np.testing.assert_allclose(np.asarray(q_bf16), np.asarray(q_ref), rtol=5e-2, atol=5e-3)
    assert q_f32.shape == (batch, 1) and q_bf16.shape == (batch, 1)

    # --- Config B: module-default hidden sizes (800, 600) -> pads to (896, 640) ---
    k_s2, k_a2, k_p2 = jax.random.split(jax.random.PRNGKey(1), 3)
    states2 = jax.random.normal(k_s2, (batch, state_dim), jnp.float32)
    actions2 = jax.random.normal(k_a2, (batch, action_dim), jnp.float32)
    raw2 = init_params(k_p2, input_size, 800, 600)
    q_ref2 = _jax_reference(states2, actions2, raw2)
    p2 = prepare_params(raw2, state_dim, compute_dtype=jnp.float32)
    q2 = jax.block_until_ready(low_dim_critic_forward(states2, actions2, p2))
    np.testing.assert_allclose(np.asarray(q2), np.asarray(q_ref2), rtol=1e-5, atol=1e-5)

    # --- Config C: multi-tile grid with a padded tail tile (batch not multiple of tb) ---
    batch3 = 300
    k_s3, k_a3 = jax.random.split(jax.random.PRNGKey(2), 2)
    states3 = jax.random.normal(k_s3, (batch3, state_dim), jnp.float32)
    actions3 = jax.random.normal(k_a3, (batch3, action_dim), jnp.float32)
    q_ref3 = _jax_reference(states3, actions3, raw)
    q3 = jax.block_until_ready(low_dim_critic_forward(states3, actions3, p_f32))
    np.testing.assert_allclose(np.asarray(q3), np.asarray(q_ref3), rtol=1e-5, atol=1e-5)
    assert q3.shape == (batch3, 1)

    print("KERNEL_OK")
</pallas_src>

<mosaic_0001>
module attributes {stable_mosaic.version = 11 : i64} {
  func.func @_critic_kernel(%arg0: i32, %arg1: memref<8x24xf32, #tpu.memory_space<vmem>>, %arg2: memref<8x8xf32, #tpu.memory_space<vmem>>, %arg3: memref<24x128xf32, #tpu.memory_space<vmem>>, %arg4: memref<8x128xf32, #tpu.memory_space<vmem>>, %arg5: memref<1x128xf32, #tpu.memory_space<vmem>>, %arg6: memref<128x128xf32, #tpu.memory_space<vmem>>, %arg7: memref<1x128xf32, #tpu.memory_space<vmem>>, %arg8: memref<128x1xf32, #tpu.memory_space<vmem>>, %arg9: memref<1x1xf32, #tpu.memory_space<vmem>>, %arg10: memref<8x1xf32, #tpu.memory_space<vmem>>) attributes {dimension_semantics = [#tpu.dimension_semantics<parallel>], iteration_bounds = array<i64: 1>, scalar_prefetch = 0 : i64, scratch_operands = 0 : i64, tpu.core_type = #tpu.core_type<tc>, window_params = [{transform_indices = @transform_0, window_bounds = array<i64: 8, 24>}, {transform_indices = @transform_1, window_bounds = array<i64: 8, 8>}, {pipeline_mode = #tpu.pipeline_mode<synchronous>, transform_indices = @transform_2, window_bounds = array<i64: 24, 128>}, {pipeline_mode = #tpu.pipeline_mode<synchronous>, transform_indices = @transform_3, window_bounds = array<i64: 8, 128>}, {pipeline_mode = #tpu.pipeline_mode<synchronous>, transform_indices = @transform_4, window_bounds = array<i64: 1, 128>}, {pipeline_mode = #tpu.pipeline_mode<synchronous>, transform_indices = @transform_5, window_bounds = array<i64: 128, 128>}, {pipeline_mode = #tpu.pipeline_mode<synchronous>, transform_indices = @transform_6, window_bounds = array<i64: 1, 128>}, {pipeline_mode = #tpu.pipeline_mode<synchronous>, transform_indices = @transform_7, window_bounds = array<i64: 128, 1>}, {pipeline_mode = #tpu.pipeline_mode<synchronous>, transform_indices = @transform_8, window_bounds = array<i64: 1, 1>}, {transform_indices = @transform_9, window_bounds = array<i64: 8, 1>}]} {
    %c0 = arith.constant 0 : index
    %c0_0 = arith.constant 0 : index
    %0 = vector.load %arg1[%c0, %c0_0] : memref<8x24xf32, #tpu.memory_space<vmem>>, vector<8x24xf32>
    %c0_1 = arith.constant 0 : index
    %c0_2 = arith.constant 0 : index
    %1 = vector.load %arg2[%c0_1, %c0_2] : memref<8x8xf32, #tpu.memory_space<vmem>>, vector<8x8xf32>
    %c0_3 = arith.constant 0 : index
    %c0_4 = arith.constant 0 : index
    %2 = vector.load %arg3[%c0_3, %c0_4] : memref<24x128xf32, #tpu.memory_space<vmem>>, vector<24x128xf32>
    %cst = arith.constant dense<0.000000e+00> : vector<8x128xf32>
    %3 = tpu.matmul %0, %2, %cst {dimension_numbers = #tpu.dot_dimension_numbers<[1], [0], [0], [1], [0, 0, 1, 1], [], []>} : vector<8x24xf32>, vector<24x128xf32>, vector<8x128xf32> -> vector<8x128xf32>
    %c0_5 = arith.constant 0 : index
    %c0_6 = arith.constant 0 : index
    %4 = vector.load %arg4[%c0_5, %c0_6] : memref<8x128xf32, #tpu.memory_space<vmem>>, vector<8x128xf32>
    %cst_7 = arith.constant dense<0.000000e+00> : vector<8x128xf32>
    %5 = tpu.matmul %1, %4, %cst_7 {dimension_numbers = #tpu.dot_dimension_numbers<[1], [0], [0], [1], [0, 0, 1, 1], [], []>} : vector<8x8xf32>, vector<8x128xf32>, vector<8x128xf32> -> vector<8x128xf32>
    %6 = arith.addf %3, %5 : vector<8x128xf32>
    %c0_8 = arith.constant 0 : index
    %c0_9 = arith.constant 0 : index
    %7 = vector.load %arg5[%c0_8, %c0_9] : memref<1x128xf32, #tpu.memory_space<vmem>>, vector<1x128xf32>
    %8 = vector.broadcast %7 : vector<1x128xf32> to vector<8x128xf32>
    %9 = arith.addf %6, %8 : vector<8x128xf32>
    %cst_10 = arith.constant 0.000000e+00 : f32
    %10 = vector.broadcast %cst_10 : f32 to vector<8x128xf32>
    %11 = arith.maximumf %9, %10 : vector<8x128xf32>
    %c0_11 = arith.constant 0 : index
    %c0_12 = arith.constant 0 : index
    %12 = vector.load %arg6[%c0_11, %c0_12] : memref<128x128xf32, #tpu.memory_space<vmem>>, vector<128x128xf32>
    %cst_13 = arith.constant dense<0.000000e+00> : vector<8x128xf32>
    %13 = tpu.matmul %11, %12, %cst_13 {dimension_numbers = #tpu.dot_dimension_numbers<[1], [0], [0], [1], [0, 0, 1, 1], [], []>} : vector<8x128xf32>, vector<128x128xf32>, vector<8x128xf32> -> vector<8x128xf32>
    %c0_14 = arith.constant 0 : index
    %c0_15 = arith.constant 0 : index
    %14 = vector.load %arg7[%c0_14, %c0_15] : memref<1x128xf32, #tpu.memory_space<vmem>>, vector<1x128xf32>
    %15 = vector.broadcast %14 : vector<1x128xf32> to vector<8x128xf32>
    %16 = arith.addf %13, %15 : vector<8x128xf32>
    %cst_16 = arith.constant 0.000000e+00 : f32
    %17 = vector.broadcast %cst_16 : f32 to vector<8x128xf32>
    %18 = arith.maximumf %16, %17 : vector<8x128xf32>
    %c0_17 = arith.constant 0 : index
    %c0_18 = arith.constant 0 : index
    %19 = vector.load %arg8[%c0_17, %c0_18] : memref<128x1xf32, #tpu.memory_space<vmem>>, vector<128x1xf32>
    %cst_19 = arith.constant dense<0.000000e+00> : vector<8x1xf32>
    %20 = tpu.matmul %18, %19, %cst_19 {dimension_numbers = #tpu.dot_dimension_numbers<[1], [0], [0], [1], [0, 0, 1, 1], [], []>} : vector<8x128xf32>, vector<128x1xf32>, vector<8x1xf32> -> vector<8x1xf32>
    %c0_20 = arith.constant 0 : index
    %c0_21 = arith.constant 0 : index
    %21 = vector.load %arg9[%c0_20, %c0_21] : memref<1x1xf32, #tpu.memory_space<vmem>>, vector<1x1xf32>
    %22 = vector.broadcast %21 : vector<1x1xf32> to vector<8x1xf32>
    %23 = arith.addf %20, %22 : vector<8x1xf32>
    %c0_22 = arith.constant 0 : index
    %c0_23 = arith.constant 0 : index
    %24 = vector.load %arg10[%c0_22, %c0_23] : memref<8x1xf32, #tpu.memory_space<vmem>>, vector<8x1xf32>
    tpu.vector_store %arg10[%c0_22, %c0_23], %23 {strides = array<i32>} : memref<8x1xf32, #tpu.memory_space<vmem>>, vector<8x1xf32>,
    return
  }
  func.func @transform_0(%arg0: i32) -> (i32, i32) {
    %c0_i32 = arith.constant 0 : i32
    %c0_i32_0 = arith.constant 0 : i32
    return %arg0, %c0_i32 : i32, i32
  }
  func.func @transform_1(%arg0: i32) -> (i32, i32) {
    %c0_i32 = arith.constant 0 : i32
    %c0_i32_0 = arith.constant 0 : i32
    return %arg0, %c0_i32 : i32, i32
  }
  func.func @transform_2(%arg0: i32) -> (i32, i32) {
    %c0_i32 = arith.constant 0 : i32
    %c0_i32_0 = arith.constant 0 : i32
    %c0_i32_1 = arith.constant 0 : i32
    return %c0_i32, %c0_i32_0 : i32, i32
  }
  func.func @transform_3(%arg0: i32) -> (i32, i32) {
    %c0_i32 = arith.constant 0 : i32
    %c0_i32_0 = arith.constant 0 : i32
    %c0_i32_1 = arith.constant 0 : i32
    return %c0_i32, %c0_i32_0 : i32, i32
  }
  func.func @transform_4(%arg0: i32) -> (i32, i32) {
    %c0_i32 = arith.constant 0 : i32
    %c0_i32_0 = arith.constant 0 : i32
    %c0_i32_1 = arith.constant 0 : i32
    return %c0_i32, %c0_i32_0 : i32, i32
  }
  func.func @transform_5(%arg0: i32) -> (i32, i32) {
    %c0_i32 = arith.constant 0 : i32
    %c0_i32_0 = arith.constant 0 : i32
    %c0_i32_1 = arith.constant 0 : i32
    return %c0_i32, %c0_i32_0 : i32, i32
  }
  func.func @transform_6(%arg0: i32) -> (i32, i32) {
    %c0_i32 = arith.constant 0 : i32
    %c0_i32_0 = arith.constant 0 : i32
    %c0_i32_1 = arith.constant 0 : i32
    return %c0_i32, %c0_i32_0 : i32, i32
  }
  func.func @transform_7(%arg0: i32) -> (i32, i32) {
    %c0_i32 = arith.constant 0 : i32
    %c0_i32_0 = arith.constant 0 : i32
    %c0_i32_1 = arith.constant 0 : i32
    return %c0_i32, %c0_i32_0 : i32, i32
  }
  func.func @transform_8(%arg0: i32) -> (i32, i32) {
    %c0_i32 = arith.constant 0 : i32
    %c0_i32_0 = arith.constant 0 : i32
    %c0_i32_1 = arith.constant 0 : i32
    return %c0_i32, %c0_i32_0 : i32, i32
  }
  func.func @transform_9(%arg0: i32) -> (i32, i32) {
    %c0_i32 = arith.constant 0 : i32
    %c0_i32_0 = arith.constant 0 : i32
    return %arg0, %c0_i32 : i32, i32
  }
}

</mosaic_0001>

<bundles_post_ra>
// kernel: tpu_custom_call.1
= control target key start
LH: loop header
LB: loop body
LE: loop exit
PB: predicated region body
PF: predicated region fallthrough
CT: control target
= control target key end

     0   :  { %s448_s0 = inlined_call_operand.vmem [shape: f32[2,24], index: 0, kind: input, shape index: {}]   ;;  %s449_s1 = inlined_call_operand.vmem [shape: f32[2,8], index: 1, kind: input, shape index: {}]   ;;  %s450_s2 = inlined_call_operand.hbm [shape: f32[24,128], index: 2, kind: input, shape index: {}]   ;;  %s451_s3 = inlined_call_operand.hbm [shape: f32[8,128], index: 3, kind: input, shape index: {}]   ;;  %s452_s4 = inlined_call_operand.vmem [shape: f32[1,128], index: 4, kind: input, shape index: {}]   ;;  %s453_s5 = inlined_call_operand.vmem [shape: f32[128,128], index: 5, kind: input, shape index: {}]   ;;  %s454_s6 = inlined_call_operand.vmem [shape: f32[1,128], index: 6, kind: input, shape index: {}]   ;;  %s455_s7 = inlined_call_operand.vmem [shape: f32[128,1], index: 7, kind: input, shape index: {}]   ;;  %s456_s8 = inlined_call_operand.<no memory space> [shape: f32[1,1], index: 8, kind: input, shape index: {}]   ;;  %s457_s9 = inlined_call_operand.vmem [shape: f32[8,1], index: 9, kind: output, shape index: {}]  }
   0x1   :  { %v14_v0 = vstv %s456_s8 }
   0x2   :  { %15 = vst [vmem:[#allocation2] sm:$0x1] %v14_v0 }
   0x3   :  { %16 = vsyncpa [#allocation4], 0  ;;  %s26_s13 = sshll.u32 %s450_s2, 4  ;;  %s27_s13 = int_to_ptr.hbm [resolvable:$true] %s26_s13 }
   0x4   :  { %17 = vsyncpa [#allocation6], 0  ;;  %s274_s14 = smov [#allocation3]   ;;  %s40_s18 = sshll.u32 %s451_s3, 4  ;;  %s41_s18 = int_to_ptr.hbm [resolvable:$true] %s40_s18 }
   0x5   :  { %s28_s15 = sshll.u32 %s274_s14, 4  ;;  %s275_s19 = smov 128   ;;  %s29_s15 = int_to_ptr.vmem [resolvable:$true] %s28_s15 }
   0x6   :  { %s276_s20 = smov 8   ;;  %s277_s8 = smov [#allocation5]  }
   0x7   :  { %34 = dma.hbm_to_vmem [thread:$0]  %s27_s13, 384, %s29_s15, [#allocation4], %s275_s19, %s275_s19, %s276_s20  }
   0x8   :  { %s42_s21 = sshll.u32 %s277_s8, 4  ;;  %s43_s21 = int_to_ptr.vmem [resolvable:$true] %s42_s21 }
   0x9   :  { %45 = dma.hbm_to_vmem [thread:$0]  %s41_s18, 128, %s43_s21, [#allocation6]  }
   0xa   :  { %270 = dma.done.wait [#allocation4], 384  }
   0xb   :  { %271 = vsyncadd [#allocation4], 4294966912 }
   0xc   :  { %272 = dma.done.wait [#allocation6], 128  }
   0xd   :  { %273 = vsyncadd [#allocation6], 4294967168  ;;  %vm70_vm0 = vcmask 64512   ;;  %v68_v1 = vld [vmem:[#allocation3 + $0x10] sm:$0xff]  ;;  %v67_v2 = vld [vmem:[#allocation3 + $0x8] sm:$0xff]  ;;  %vm94_vm1 = vcmask 195584  }
   0xe   :  { %v69_v3 = vld [vmem:[#allocation5] sm:$0xff]  ;;  %111 = vmatpush.msra.mxu1 %v68_v1  ;;  %v66_v5 = vld [vmem:[#allocation3] sm:$0xff]  ;;  %v138_v7 = vld [vmem:[%s453_s5 + $0x70] sm:$0xff]  ;;  %vm205_vm2 = vcmask 7168  }
   0xf   :  { %89 = vmatpush.msra.mxu0 %v69_v3  ;;  %v65_v4 = vld [vmem:[%s449_s1] sm:$0xff]  ;;  %v139_v6 = vld [vmem:[%s453_s5 + $0x78] sm:$0xff]  ;;  %v137_v9 = vld [vmem:[%s453_s5 + $0x68] sm:$0xff] }
  0x10   :  { %213 = vmatmul.msk.f32.vlgmr.msra.gmra.mxu0 %vm70_vm0, %v65_v4  ;;  %112 = vmatpush.msra.mxu1 %v67_v2  ;;  %v64_v8 = vld [vmem:[%s448_s0] sm:$0xff]  ;;  %v135_v11 = vld [vmem:[%s453_s5 + $0x58] sm:$0xff]  ;;  %v134_v12 = vld [vmem:[%s453_s5 + $0x50] sm:$0xff] }
  0x11   :  { %144 = vmatpush.msra.mxu2 %v139_v6  ;;  %v136_v10 = vld [vmem:[%s453_s5 + $0x60] sm:$0xff]  ;;  %v133_v13 = vld [vmem:[%s453_s5 + $0x48] sm:$0xff]  ;;  %v131_v15 = vld [vmem:[%s453_s5 + $0x38] sm:$0xff] }
  0x12   :  { %113 = vmatpush.msra.mxu1 %v66_v5  ;;  %v132_v14 = vld [vmem:[%s453_s5 + $0x40] sm:$0xff]  ;;  %v130_v16 = vld [vmem:[%s453_s5 + $0x30] sm:$0xff]  ;;  %v129_v17 = vld [vmem:[%s453_s5 + $0x28] sm:$0xff] }
  0x13   :  { %145 = vmatpush.msra.mxu2 %v138_v7  ;;  %214 = vmatmul.msk.f32.vlgmr.msra.gmra.mxu1 %vm94_vm1, %v64_v8  ;;  %v128_v18 = vld [vmem:[%s453_s5 + $0x20] sm:$0xff]  ;;  %v127_v19 = vld [vmem:[%s453_s5 + $0x18] sm:$0xff]  ;;  %v126_v20 = vld [vmem:[%s453_s5 + $0x10] sm:$0xff] }
  0x14   :  { %v125_v21 = vld [vmem:[%s453_s5 + $0x8] sm:$0xff]  ;;  %v124_v22 = vld [vmem:[%s453_s5] sm:$0xff]  ;;  %v180_v23 = vld [vmem:[%s455_s7 + $0x78] sm:$0xff] }
  0x15   :  { %146 = vmatpush.msra.mxu2 %v137_v9  ;;  %v179_v24 = vld [vmem:[%s455_s7 + $0x70] sm:$0xff]  ;;  %185 = vmatpush.msra.mxu3 %v180_v23  ;;  %v178_v25 = vld [vmem:[%s455_s7 + $0x68] sm:$0xff]  ;;  %v177_v26 = vld [vmem:[%s455_s7 + $0x60] sm:$0xff] }
  0x16   :  { %v176_v27 = vld [vmem:[%s455_s7 + $0x58] sm:$0xff]  ;;  %v175_v28 = vld [vmem:[%s455_s7 + $0x50] sm:$0xff]  ;;  %v174_v29 = vld [vmem:[%s455_s7 + $0x48] sm:$0xff] }
  0x17   :  { %147 = vmatpush.msra.mxu2 %v136_v10  ;;  %186 = vmatpush.msra.mxu3 %v179_v24  ;;  %v173_v30 = vld [vmem:[%s455_s7 + $0x40] sm:$0xff]  ;;  %v172_v31 = vld [vmem:[%s455_s7 + $0x38] sm:$0xff]  ;;  %v171_v32 = vld [vmem:[%s455_s7 + $0x30] sm:$0xff] }
  0x18   :  { %v170_v33 = vld [vmem:[%s455_s7 + $0x28] sm:$0xff]  ;;  %v169_v34 = vld [vmem:[%s455_s7 + $0x20] sm:$0xff]  ;;  %v168_v35 = vld [vmem:[%s455_s7 + $0x18] sm:$0xff] }
  0x19   :  { %148 = vmatpush.msra.mxu2 %v135_v11  ;;  %187 = vmatpush.msra.mxu3 %v178_v25  ;;  %v219_v37 = vld [vmem:[%s452_s4] ss:$0 sm:$0xff]  ;;  %v167_v42 = vld [vmem:[%s455_s7 + $0x10] sm:$0xff]  ;;  %v166_v43 = vld [vmem:[%s455_s7 + $0x8] sm:$0xff] }
  0x1a   :  { %v165_v44 = vld [vmem:[%s455_s7] sm:$0xff] }
  0x1b   :  { %149 = vmatpush.msra.mxu2 %v134_v12  ;;  %188 = vmatpush.msra.mxu3 %v177_v26  ;;  %v220_v45 = vld [vmem:[%s454_s6] ss:$0 sm:$0xff] }
  0x1c   :  { %v221_v49 = vld [vmem:[#allocation2] ss:$0 sm:$0xff] }
  0x1d   :  { %150 = vmatpush.msra.mxu2 %v133_v13  ;;  %189 = vmatpush.msra.mxu3 %v176_v27 }
  0x1f   :  { %151 = vmatpush.msra.mxu2 %v132_v14  ;;  %190 = vmatpush.msra.mxu3 %v175_v28 }
  0x21   :  { %152 = vmatpush.msra.mxu2 %v131_v15  ;;  %191 = vmatpush.msra.mxu3 %v174_v29 }
  0x23   :  { %153 = vmatpush.msra.mxu2 %v130_v16  ;;  %192 = vmatpush.msra.mxu3 %v173_v30 }
  0x25   :  { %154 = vmatpush.msra.mxu2 %v129_v17  ;;  %193 = vmatpush.msra.mxu3 %v172_v31 }
  0x27   :  { %155 = vmatpush.msra.mxu2 %v128_v18  ;;  %194 = vmatpush.msra.mxu3 %v171_v32 }
  0x29   :  { %156 = vmatpush.msra.mxu2 %v127_v19  ;;  %195 = vmatpush.msra.mxu3 %v170_v33 }
  0x2b   :  { %157 = vmatpush.msra.mxu2 %v126_v20  ;;  %196 = vmatpush.msra.mxu3 %v169_v34 }
  0x2d   :  { %158 = vmatpush.msra.mxu2 %v125_v21  ;;  %197 = vmatpush.msra.mxu3 %v168_v35 }
  0x2f   :  { %159 = vmatpush.msra.mxu2 %v124_v22  ;;  %198 = vmatpush.msra.mxu3 %v167_v42 }
  0x31   :  { %199 = vmatpush.msra.mxu3 %v166_v43 }
  0x33   :  { %200 = vmatpush.msra.mxu3 %v165_v44 }
  0x8d   :  { %v91_v36 = vpop.f32.mrf.mxu0 }
  0x90   :  { %v115_v38 = vpop.f32.mrf.mxu1 }
  0x91   :  { %v116_v39 = vadd.f32 %v115_v38, %v91_v36 }
  0x93   :  { %v122_v40 = vadd.f32 %v219_v37, %v116_v39 }
  0x95   :  { %v123_v41 = vmax.f32 %v122_v40, 0.0 }
  0x97   :  { %160 = vmatmul.f32.vlgmr.msra.gmra.mxu2 %v123_v41 }
 0x11a   :  { %v161_v46 = vpop.f32.mrf.mxu2 }
 0x11b   :  { %v162_v47 = vadd.f32 %v220_v45, %v161_v46 }
 0x11d   :  { %v164_v48 = vmax.f32 %v162_v47, 0.0 }
 0x11f   :  { %201 = vmatmul.f32.vlgmr.msra.gmra.mxu3 %v164_v48 }
 0x1a2   :  { %v202_v50 = vpop.f32.mrf.mxu3 }
 0x1a3   :  { %v203_v51 = vadd.f32 %v221_v49, %v202_v50 }
 0x1a5   :  { %206 = vst.msk [vmem:[%s457_s9] sm:$0xff] %vm205_vm2, %v203_v51 }
 0x1a6   :  { %211 = vsyncpa [#allocation4], 1 }
 0x1a7   :  { %212 = vsyncpa [#allocation6], 1 }

</bundles_post_ra>
